<compile_context>
chip_gen: v5e
topology: v5e:2x2
jax: 0.10.0
libtpu: 0.0.40
codegen_flags: <defaults>
</compile_context>

<pallas_src>
import functools

import jax
import jax.numpy as jnp
from jax.experimental import pallas as pl
from jax.experimental.pallas import tpu as pltpu


def _vq_kernel(x_ref, e_ref, et_ref, e2_ref, idx_ref, q_ref, ploss_ref,
               *, m_total, block_m):
    """Process one (TM, D) tile of rows against the resident (K, D) codebook."""
    i = pl.program_id(0)

    x = x_ref[...]                        # (TM, D) f32
    e = e_ref[...]                        # (K, D)  f32 codebook (resident)
    et = et_ref[...]                      # (D, K)  codebook, pre-transposed (resident)
    e2 = e2_ref[...]                      # (1, K)  f32 |e_k|^2 (precomputed)
    tm = x.shape[0]
    k = e.shape[0]

    # argmin_k |x - e_k|^2 == argmin_k (|e_k|^2 - 2<x, e_k>); the per-row |x|^2
    # term is constant over k, so it is dropped from the argmin path.  The
    # pre-transposed codebook makes this a natural (m,d)@(d,k) MXU contraction.
    xe = jnp.dot(x.astype(et.dtype), et,
                 preferred_element_type=jnp.float32)              # (TM, K)
    dist_p = e2 - 2.0 * xe                                        # (TM, K) f32

    # first-occurrence argmin along the codebook axis (torch.argmin semantics)
    mind = jnp.min(dist_p, axis=1, keepdims=True)                 # (TM, 1)
    col = jax.lax.broadcasted_iota(jnp.int32, (tm, k), 1)         # (TM, K)
    idx = jnp.min(jnp.where(dist_p <= mind, col, k),
                  axis=1, keepdims=True)                          # (TM, 1) i32

    # quantized = one_hot @ codebook, entirely f32 -> exact codebook rows
    # (selection with 1.0/0.0 weights introduces no rounding).
    enc = (col == idx).astype(jnp.float32)                        # (TM, K)
    q = jnp.dot(enc, e, preferred_element_type=jnp.float32)       # (TM, D)

    # valid-row mask (handles a zero-padded tail tile when TM does not divide M)
    row = jax.lax.broadcasted_iota(jnp.int32, (tm, 1), 0) + i * block_m
    valid = (row < m_total).astype(jnp.float32)                   # (TM, 1)

    # e-latent-loss partial: |x_m - e_{idx_m}|^2 == mind_m + |x_m|^2, so no
    # (TM, D) diff/square/full-reduce is needed per tile.
    x2 = jnp.sum(x * x, axis=1, keepdims=True)                    # (TM, 1)
    ploss_ref[...] = jnp.reshape(jnp.sum(valid * (mind + x2)), (1, 1, 1))

    idx_ref[...] = idx
    q_ref[...] = q


def vector_quantizer_ema_forward(x_nchw, emb_w, commitment_cost=0.25,
                                 block_m=2048, distance_in_bf16=False):
    """Mirrors VectorQuantizerEMA.forward (eval-mode value semantics)."""
    N, C, H, W = x_nchw.shape
    K, D = emb_w.shape
    assert C == D, "channel dim must equal embedding_dim"
    M = N * H * W

    # NCHW -> NHWC -> (M, D); codebook prep hoisted out of the per-tile loop.
    flat_x = jnp.transpose(x_nchw, (0, 2, 3, 1)).reshape(M, D).astype(jnp.float32)
    e = emb_w.astype(jnp.float32)                              # (K, D)
    et_dtype = jnp.bfloat16 if distance_in_bf16 else jnp.float32
    e_t = jnp.transpose(e).astype(et_dtype)                    # (D, K)
    e2 = jnp.sum(e * e, axis=1)[None, :]                       # (1, K)

    # --- device-aware VMEM budget and row-tile selection ---------------------
    try:
        vmem_cap = int(pltpu.get_tpu_info().vmem_capacity_bytes)
    except Exception:                      # non-TPU / interpret-mode fallback
        vmem_cap = 64 * 2**20              # v7x per-TC floor
    vmem_budget = max(32 * 2**20, vmem_cap - 16 * 2**20)

    def tile_bytes(tm):
        # x in + q out (double-buffered), idx out (lane-padded (tm,1) buffers),
        # both resident codebook orientations, ~6 (TM,K) f32 temps, slack.
        return 4 * (4 * tm * D + 2 * tm * 128 + 4 * K * D + 6 * tm * K + 8192)

    tm_cap = 128
    while tm_cap + 128 <= 8192 and tile_bytes(tm_cap + 128) <= vmem_budget:
        tm_cap += 128

    m_rounded = ((M + 127) // 128) * 128
    tm = max(128, min(block_m, tm_cap, m_rounded))
    tm = (tm // 128) * 128
    if M > 128 and -(-M // tm) < 2:
        # keep >= 2 grid steps when the data allows it (feeds both v7x TCs)
        tm = max(128, ((-(-M // 2) + 127) // 128) * 128)
    num_tiles = -(-M // tm)
    m_pad = num_tiles * tm
    if m_pad != M:
        flat_x = jnp.pad(flat_x, ((0, m_pad - M), (0, 0)))

    kernel = functools.partial(_vq_kernel, m_total=M, block_m=tm)

    cost = pl.CostEstimate(
        flops=4 * m_pad * K * D,                  # distance + selection matmuls
        transcendentals=0,
        bytes_accessed=4 * (2 * m_pad * D + 2 * K * D + K + m_pad + num_tiles),
    )

    idx, q_flat, ploss = pl.pallas_call(
        kernel,
        grid=(num_tiles,),
        in_specs=[
            pl.BlockSpec((tm, D), lambda i: (i, 0)),        # x row tile
            pl.BlockSpec((K, D), lambda i: (0, 0)),         # codebook, resident
            pl.BlockSpec((D, K), lambda i: (0, 0)),         # codebook^T, resident
            pl.BlockSpec((1, K), lambda i: (0, 0)),         # |e|^2, resident
        ],
        out_specs=(
            pl.BlockSpec((tm, 1), lambda i: (i, 0)),        # nearest-code index
            pl.BlockSpec((tm, D), lambda i: (i, 0)),        # quantized rows (exact)
            pl.BlockSpec((1, 1, 1), lambda i: (i, 0, 0)),   # partial loss sum
        ),
        out_shape=(
            jax.ShapeDtypeStruct((m_pad, 1), jnp.int32),
            jax.ShapeDtypeStruct((m_pad, D), jnp.float32),
            jax.ShapeDtypeStruct((num_tiles, 1, 1), jnp.float32),
        ),
        compiler_params=pltpu.CompilerParams(
            dimension_semantics=("parallel",),   # M tiles independent
            vmem_limit_bytes=int(vmem_budget),
        ),
        cost_estimate=cost,
    )(flat_x, e, e_t, e2)

    # Tiny finalization + dense one-hot (the module returns it) in plain JAX.
    loss = jnp.float32(commitment_cost) * (jnp.sum(ploss) / jnp.float32(M * D))
    encodings = jax.nn.one_hot(idx[:M, 0], K, dtype=jnp.float32)
    avg_probs = jnp.mean(encodings, axis=0)
    perplexity = jnp.exp(-jnp.sum(avg_probs * jnp.log(avg_probs + 1e-10)))
    quantized_nchw = jnp.transpose(q_flat[:M].reshape(N, H, W, C), (0, 3, 1, 2))
    return loss, quantized_nchw, perplexity, encodings


def _reference_forward(x_nchw, emb_w, commitment_cost=0.25):
    """Pure-JAX reference of the same forward pass (for sanity checking)."""
    N, C, H, W = x_nchw.shape
    K, D = emb_w.shape
    x_nhwc = jnp.transpose(x_nchw, (0, 2, 3, 1))
    flat = x_nhwc.reshape(-1, D)
    dist = (jnp.sum(flat ** 2, axis=1, keepdims=True)
            + jnp.sum(emb_w ** 2, axis=1)
            - 2.0 * jnp.dot(flat, emb_w.T, precision=jax.lax.Precision.HIGHEST))
    idx = jnp.argmin(dist, axis=1)
    enc = jax.nn.one_hot(idx, K, dtype=jnp.float32)
    q = emb_w[idx]                               # exact codebook rows
    e_latent_loss = jnp.mean((q - flat) ** 2)
    loss = commitment_cost * e_latent_loss
    avg_probs = jnp.mean(enc, axis=0)
    perp = jnp.exp(-jnp.sum(avg_probs * jnp.log(avg_probs + 1e-10)))
    q_nchw = jnp.transpose(q.reshape(N, H, W, C), (0, 3, 1, 2))
    return loss, q_nchw, perp, enc


if __name__ == "__main__":
    # Small, module-consistent shapes.
    num_embeddings = 128     # K
    embedding_dim = 64       # D  (== channel dim of the NCHW input)
    commitment_cost = 0.25
    N, H, W = 2, 8, 8        # M = N*H*W = 128 codebook lookups

    key = jax.random.PRNGKey(0)
    kx, ke = jax.random.split(key)
    x = jax.random.normal(kx, (N, embedding_dim, H, W), dtype=jnp.float32)
    # deterministic stand-in for nn.Embedding.weight.data.normal_()
    emb_w = jax.random.normal(ke, (num_embeddings, embedding_dim),
                              dtype=jnp.float32)

    loss, quantized, perplexity, encodings = jax.block_until_ready(
        vector_quantizer_ema_forward(x, emb_w, commitment_cost))

    # Sanity check against the pure-JAX reference (tighter than before: the
    # kernel now selects exact f32 codebook rows).
    r_loss, r_q, r_perp, r_enc = _reference_forward(x, emb_w, commitment_cost)
    assert quantized.shape == (N, embedding_dim, H, W)
    assert encodings.shape == (N * H * W, num_embeddings)
    assert jnp.allclose(encodings, r_enc)
    assert jnp.allclose(quantized, r_q, rtol=1e-4, atol=1e-4)
    assert jnp.allclose(loss, r_loss, rtol=1e-3, atol=1e-4)
    assert jnp.allclose(perplexity, r_perp, rtol=1e-3, atol=1e-3)

    print("KERNEL_OK")
</pallas_src>

<mosaic_0001>
module attributes {stable_mosaic.version = 11 : i64} {
  func.func @_vq_kernel(%arg0: i32, %arg1: memref<128x64xf32, #tpu.memory_space<vmem>>, %arg2: memref<128x64xf32, #tpu.memory_space<vmem>>, %arg3: memref<64x128xf32, #tpu.memory_space<vmem>>, %arg4: memref<1x128xf32, #tpu.memory_space<vmem>>, %arg5: memref<128x1xi32, #tpu.memory_space<vmem>>, %arg6: memref<128x64xf32, #tpu.memory_space<vmem>>, %arg7: memref<1x1x1xf32, #tpu.memory_space<vmem>>) attributes {dimension_semantics = [#tpu.dimension_semantics<parallel>], iteration_bounds = array<i64: 1>, scalar_prefetch = 0 : i64, scratch_operands = 0 : i64, tpu.core_type = #tpu.core_type<tc>, window_params = [{transform_indices = @transform_0, window_bounds = array<i64: 128, 64>}, {pipeline_mode = #tpu.pipeline_mode<synchronous>, transform_indices = @transform_1, window_bounds = array<i64: 128, 64>}, {pipeline_mode = #tpu.pipeline_mode<synchronous>, transform_indices = @transform_2, window_bounds = array<i64: 64, 128>}, {pipeline_mode = #tpu.pipeline_mode<synchronous>, transform_indices = @transform_3, window_bounds = array<i64: 1, 128>}, {transform_indices = @transform_4, window_bounds = array<i64: 128, 1>}, {transform_indices = @transform_5, window_bounds = array<i64: 128, 64>}, {transform_indices = @transform_6, window_bounds = array<i64: 1, 1, 1>}]} {
    %c0 = arith.constant 0 : index
    %c0_0 = arith.constant 0 : index
    %0 = vector.load %arg1[%c0, %c0_0] : memref<128x64xf32, #tpu.memory_space<vmem>>, vector<128x64xf32>
    %c0_1 = arith.constant 0 : index
    %c0_2 = arith.constant 0 : index
    %1 = vector.load %arg2[%c0_1, %c0_2] : memref<128x64xf32, #tpu.memory_space<vmem>>, vector<128x64xf32>
    %c0_3 = arith.constant 0 : index
    %c0_4 = arith.constant 0 : index
    %2 = vector.load %arg3[%c0_3, %c0_4] : memref<64x128xf32, #tpu.memory_space<vmem>>, vector<64x128xf32>
    %c0_5 = arith.constant 0 : index
    %c0_6 = arith.constant 0 : index
    %3 = vector.load %arg4[%c0_5, %c0_6] : memref<1x128xf32, #tpu.memory_space<vmem>>, vector<1x128xf32>
    %cst = arith.constant dense<0.000000e+00> : vector<128x128xf32>
    %4 = tpu.matmul %0, %2, %cst {dimension_numbers = #tpu.dot_dimension_numbers<[1], [0], [0], [1], [0, 0, 1, 1], [], []>} : vector<128x64xf32>, vector<64x128xf32>, vector<128x128xf32> -> vector<128x128xf32>
    %cst_7 = arith.constant 2.000000e+00 : f32
    %5 = vector.broadcast %cst_7 : f32 to vector<128x128xf32>
    %6 = arith.mulf %5, %4 : vector<128x128xf32>
    %7 = vector.broadcast %3 : vector<1x128xf32> to vector<128x128xf32>
    %8 = arith.subf %7, %6 : vector<128x128xf32>
    %cst_8 = arith.constant dense<0x7F800000> : vector<128xf32>
    %9 = vector.multi_reduction <minimumf>, %8, %cst_8 [1] : vector<128x128xf32> to vector<128xf32>
    %10 = vector.shape_cast %9 : vector<128xf32> to vector<128x1xf32>
    %11 = tpu.iota {dimensions = array<i32: 1>} : vector<128x128xi32>
    %12 = vector.broadcast %10 : vector<128x1xf32> to vector<128x128xf32>
    %13 = arith.cmpf ole, %8, %12 : vector<128x128xf32>
    %c128_i32 = arith.constant 128 : i32
    %14 = vector.broadcast %c128_i32 : i32 to vector<128x128xi32>
    %15 = arith.select %13, %11, %14 : vector<128x128xi1>, vector<128x128xi32>
    %cst_9 = arith.constant dense<2147483647> : vector<128xi32>
    %16 = vector.multi_reduction <minsi>, %15, %cst_9 [1] : vector<128x128xi32> to vector<128xi32>
    %17 = vector.shape_cast %16 : vector<128xi32> to vector<128x1xi32>
    %18 = vector.broadcast %17 : vector<128x1xi32> to vector<128x128xi32>
    %19 = arith.cmpi eq, %11, %18 : vector<128x128xi32>
    %20 = arith.extui %19 : vector<128x128xi1> to vector<128x128xi32>
    %21 = arith.sitofp %20 : vector<128x128xi32> to vector<128x128xf32>
    %cst_10 = arith.constant dense<0.000000e+00> : vector<128x64xf32>
    %22 = tpu.matmul %21, %1, %cst_10 {dimension_numbers = #tpu.dot_dimension_numbers<[1], [0], [0], [1], [0, 0, 1, 1], [], []>} : vector<128x128xf32>, vector<128x64xf32>, vector<128x64xf32> -> vector<128x64xf32>
    %23 = tpu.iota {dimensions = array<i32: 0>} : vector<128x1xi32>
    %c128_i32_11 = arith.constant 128 : i32
    %24 = arith.muli %arg0, %c128_i32_11 : i32
    %25 = vector.broadcast %24 : i32 to vector<128x1xi32>
    %26 = arith.addi %23, %25 : vector<128x1xi32>
    %c128_i32_12 = arith.constant 128 : i32
    %27 = vector.broadcast %c128_i32_12 : i32 to vector<128x1xi32>
    %28 = arith.cmpi slt, %26, %27 : vector<128x1xi32>
    %29 = arith.extui %28 : vector<128x1xi1> to vector<128x1xi32>
    %30 = arith.sitofp %29 : vector<128x1xi32> to vector<128x1xf32>
    %31 = arith.mulf %0, %0 : vector<128x64xf32>
    %cst_13 = arith.constant dense<0.000000e+00> : vector<128xf32>
    %32 = vector.multi_reduction <add>, %31, %cst_13 [1] : vector<128x64xf32> to vector<128xf32>
    %33 = vector.shape_cast %32 : vector<128xf32> to vector<128x1xf32>
    %34 = arith.addf %10, %33 : vector<128x1xf32>
    %35 = arith.mulf %30, %34 : vector<128x1xf32>
    %36 = vector.shape_cast %35 : vector<128x1xf32> to vector<1x128x1xf32>
    %cst_14 = arith.constant dense<0.000000e+00> : vector<1xf32>
    %37 = vector.multi_reduction <add>, %36, %cst_14 [1, 2] : vector<1x128x1xf32> to vector<1xf32>
    %38 = vector.shape_cast %37 : vector<1xf32> to vector<1x1x1xf32>
    %39 = vector.extract %38[0, 0, 0] : f32 from vector<1x1x1xf32>
    %40 = vector.broadcast %39 : f32 to vector<1x1x1xf32>
    %c0_15 = arith.constant 0 : index
    %c0_16 = arith.constant 0 : index
    %c0_17 = arith.constant 0 : index
    %41 = vector.load %arg7[%c0_15, %c0_16, %c0_17] : memref<1x1x1xf32, #tpu.memory_space<vmem>>, vector<1x1x1xf32>
    tpu.vector_store %arg7[%c0_15, %c0_16, %c0_17], %40 {strides = array<i32>} : memref<1x1x1xf32, #tpu.memory_space<vmem>>, vector<1x1x1xf32>,
    %c0_18 = arith.constant 0 : index
    %c0_19 = arith.constant 0 : index
    %42 = vector.load %arg5[%c0_18, %c0_19] : memref<128x1xi32, #tpu.memory_space<vmem>>, vector<128x1xi32>
    tpu.vector_store %arg5[%c0_18, %c0_19], %17 {strides = array<i32>} : memref<128x1xi32, #tpu.memory_space<vmem>>, vector<128x1xi32>,
    %c0_20 = arith.constant 0 : index
    %c0_21 = arith.constant 0 : index
    %43 = vector.load %arg6[%c0_20, %c0_21] : memref<128x64xf32, #tpu.memory_space<vmem>>, vector<128x64xf32>
    tpu.vector_store %arg6[%c0_20, %c0_21], %22 {strides = array<i32>} : memref<128x64xf32, #tpu.memory_space<vmem>>, vector<128x64xf32>,
    return
  }
  func.func @transform_0(%arg0: i32) -> (i32, i32) {
    %c0_i32 = arith.constant 0 : i32
    %c0_i32_0 = arith.constant 0 : i32
    return %arg0, %c0_i32 : i32, i32
  }
  func.func @transform_1(%arg0: i32) -> (i32, i32) {
    %c0_i32 = arith.constant 0 : i32
    %c0_i32_0 = arith.constant 0 : i32
    %c0_i32_1 = arith.constant 0 : i32
    return %c0_i32, %c0_i32_0 : i32, i32
  }
  func.func @transform_2(%arg0: i32) -> (i32, i32) {
    %c0_i32 = arith.constant 0 : i32
    %c0_i32_0 = arith.constant 0 : i32
    %c0_i32_1 = arith.constant 0 : i32
    return %c0_i32, %c0_i32_0 : i32, i32
  }
  func.func @transform_3(%arg0: i32) -> (i32, i32) {
    %c0_i32 = arith.constant 0 : i32
    %c0_i32_0 = arith.constant 0 : i32
    %c0_i32_1 = arith.constant 0 : i32
    return %c0_i32, %c0_i32_0 : i32, i32
  }
  func.func @transform_4(%arg0: i32) -> (i32, i32) {
    %c0_i32 = arith.constant 0 : i32
    %c0_i32_0 = arith.constant 0 : i32
    return %arg0, %c0_i32 : i32, i32
  }
  func.func @transform_5(%arg0: i32) -> (i32, i32) {
    %c0_i32 = arith.constant 0 : i32
    %c0_i32_0 = arith.constant 0 : i32
    return %arg0, %c0_i32 : i32, i32
  }
  func.func @transform_6(%arg0: i32) -> (i32, i32, i32) {
    %c0_i32 = arith.constant 0 : i32
    %c0_i32_0 = arith.constant 0 : i32
    %c0_i32_1 = arith.constant 0 : i32
    return %arg0, %c0_i32, %c0_i32_0 : i32, i32, i32
  }
}

</mosaic_0001>

<bundles_post_ra>
// kernel: tpu_custom_call.1
= control target key start
LH: loop header
LB: loop body
LE: loop exit
PB: predicated region body
PF: predicated region fallthrough
CT: control target
= control target key end

     0   :  { %s1785_s0 = inlined_call_operand.vmem [shape: f32[128,64], index: 0, kind: input, shape index: {}]   ;;  %s1786_s1 = inlined_call_operand.vmem [shape: f32[128,64], index: 1, kind: input, shape index: {}]   ;;  %s1787_s2 = inlined_call_operand.vmem [shape: f32[64,128], index: 2, kind: input, shape index: {}]   ;;  %s1788_s3 = inlined_call_operand.vmem [shape: f32[1,128], index: 3, kind: input, shape index: {}]   ;;  %s1789_s4 = inlined_call_operand.vmem [shape: s32[128,1], index: 4, kind: output, shape index: {0}]   ;;  %s1790_s5 = inlined_call_operand.vmem [shape: f32[128,64], index: 5, kind: output, shape index: {1}]   ;;  %s1791_s6 = inlined_call_operand.hbm [shape: f32[1,1,1], index: 6, kind: output, shape index: {2}]  }
   0x1   :  { %v60_v0 = vld [vmem:[%s1787_s2 + $0x38] sm:$0xff]  ;;  %v59_v1 = vld [vmem:[%s1787_s2 + $0x30] sm:$0xff]  ;;  %v58_v2 = vld [vmem:[%s1787_s2 + $0x28] sm:$0xff] }
   0x2   :  { %119 = vmatpush.msra.mxu0 %v60_v0  ;;  %941 = vmatpush.msra.mxu3 %v60_v0  ;;  %v57_v3 = vld [vmem:[%s1787_s2 + $0x20] sm:$0xff] }
   0x4   :  { %120 = vmatpush.msra.mxu0 %v59_v1  ;;  %942 = vmatpush.msra.mxu3 %v59_v1 }
   0x6   :  { %121 = vmatpush.msra.mxu0 %v58_v2  ;;  %943 = vmatpush.msra.mxu3 %v58_v2 }
   0x7   :  { %12 = vsyncpa [#allocation3], 0  ;;  %v56_v4 = vld [vmem:[%s1787_s2 + $0x18] sm:$0xff]  ;;  %v55_v5 = vld [vmem:[%s1787_s2 + $0x10] sm:$0xff]  ;;  %vm62_vm0 = vcmask 523264   ;;  %s1013_s29 = smov [#allocation2]  }
   0x8   :  { %122 = vmatpush.msra.mxu0 %v57_v3  ;;  %944 = vmatpush.msra.mxu3 %v57_v3  ;;  %v54_v6 = vld [vmem:[%s1787_s2 + $0x8] sm:$0xff]  ;;  %v53_v7 = vld [vmem:[%s1787_s2] sm:$0xff]  ;;  %v1095_v11 = vld [vmem:[%s1785_s0 + $0x50] sm:$0xff]  ;;  %s878_s30 = sshll.u32 %s1013_s29, 4  ;;  %s880_s9 = sshll.u32 %s1791_s6, 4  ;;  %s879_s30 = int_to_ptr.vmem [resolvable:$true] %s878_s30  ;;  %s881_s9 = int_to_ptr.hbm [resolvable:$true] %s880_s9 }
   0x9   :  { %v1076_v8 = vld [vmem:[%s1785_s0] sm:$0xff]  ;;  %v1081_v9 = vld [vmem:[%s1785_s0 + $0x48] sm:$0xff]  ;;  %v1104_v12 = vld [vmem:[%s1785_s0 + $0x10] sm:$0xff] }
   0xa   :  { %123 = vmatpush.msra.mxu0 %v56_v4  ;;  %945 = vmatpush.msra.mxu3 %v56_v4  ;;  %v1090_v10 = vld [vmem:[%s1785_s0 + $0x8] sm:$0xff]  ;;  %v1109_v13 = vld [vmem:[%s1785_s0 + $0x58] sm:$0xff]  ;;  %v1123_v15 = vld [vmem:[%s1785_s0 + $0x60] sm:$0xff] }
   0xb   :  { %v1118_v14 = vld [vmem:[%s1785_s0 + $0x18] sm:$0xff]  ;;  %v1132_v16 = vld [vmem:[%s1785_s0 + $0x20] sm:$0xff]  ;;  %v1137_v17 = vld [vmem:[%s1785_s0 + $0x68] sm:$0xff] }
   0xc   :  { %124 = vmatpush.msra.mxu0 %v55_v5  ;;  %946 = vmatpush.msra.mxu3 %v55_v5  ;;  %v1146_v18 = vld [vmem:[%s1785_s0 + $0x28] sm:$0xff]  ;;  %v1151_v19 = vld [vmem:[%s1785_s0 + $0x70] sm:$0xff]  ;;  %v1165_v21 = vld [vmem:[%s1785_s0 + $0x78] sm:$0xff] }
   0xd   :  { %v1160_v20 = vld [vmem:[%s1785_s0 + $0x30] sm:$0xff]  ;;  %v1174_v22 = vld [vmem:[%s1785_s0 + $0x38] sm:$0xff]  ;;  %v1181_v23 = vld [vmem:[%s1785_s0 + $0x40] sm:$0xff] }
   0xe   :  { %125 = vmatpush.msra.mxu0 %v54_v6  ;;  %947 = vmatpush.msra.mxu3 %v54_v6  ;;  %v985_v27 = vld [vmem:[%s1788_s3] ss:$0 sm:$0xff] }
  0x10   :  { %126 = vmatpush.msra.mxu0 %v53_v7  ;;  %948 = vmatpush.msra.mxu3 %v53_v7 }
  0x11   :  { %893 = vmatmul.msk.f32.vlgmr.msra.gmra.mxu0 %vm62_vm0, %v1076_v8  ;;  %902 = vmatmul.msk.f32.vlgmr.msra.gmra.mxu3 %vm62_vm0, %v1081_v9 }
  0x19   :  { %894 = vmatmul.msk.f32.gmra.mxu0 %vm62_vm0, %v1090_v10  ;;  %903 = vmatmul.msk.f32.gmra.mxu3 %vm62_vm0, %v1095_v11 }
  0x21   :  { %895 = vmatmul.msk.f32.gmra.mxu0 %vm62_vm0, %v1104_v12  ;;  %904 = vmatmul.msk.f32.gmra.mxu3 %vm62_vm0, %v1109_v13 }
  0x29   :  { %896 = vmatmul.msk.f32.gmra.mxu0 %vm62_vm0, %v1118_v14  ;;  %905 = vmatmul.msk.f32.gmra.mxu3 %vm62_vm0, %v1123_v15 }
  0x31   :  { %897 = vmatmul.msk.f32.gmra.mxu0 %vm62_vm0, %v1132_v16  ;;  %906 = vmatmul.msk.f32.gmra.mxu3 %vm62_vm0, %v1137_v17 }
  0x39   :  { %898 = vmatmul.msk.f32.gmra.mxu0 %vm62_vm0, %v1146_v18  ;;  %907 = vmatmul.msk.f32.gmra.mxu3 %vm62_vm0, %v1151_v19 }
  0x41   :  { %899 = vmatmul.msk.f32.gmra.mxu0 %vm62_vm0, %v1160_v20  ;;  %908 = vmatmul.msk.f32.gmra.mxu3 %vm62_vm0, %v1165_v21 }
  0x49   :  { %900 = vmatmul.msk.f32.gmra.mxu0 %vm62_vm0, %v1174_v22 }
  0x51   :  { %901 = vmatmul.msk.f32.gmra.mxu0 %vm62_vm0, %v1181_v23 }
  0x8e   :  { %v128_v24 = vpop.f32.mrf.mxu0 }
  0x8f   :  { %v176_v54 = vmul.f32 2.0, %v128_v24 }
  0x91   :  { %v195_v58 = vsub.f32 %v985_v27, %v176_v54 }
  0x94   :  { %v155_v25 = vpop.f32.mrf.mxu3 }
  0x95   :  { %v185_v26 = vmul.f32 2.0, %v155_v25  ;;  %v243_v25 = vlaneseq }
  0x96   :  { %v131_v28 = vpop.f32.mrf.mxu0 }
  0x97   :  { %v177_v29 = vmul.f32 2.0, %v131_v28  ;;  %v1188_v30 = vsub.f32 %v985_v27, %v185_v26  ;;  %v1224_v26 = vand.u32 127, %v243_v25 }
  0x99   :  { %229 = vmin.xlane.f32.xlu2 %v1188_v30  ;;  %v1191_v31 = vsub.f32 %v985_v27, %v177_v29 }
  0x9b   :  { %213 = vmin.xlane.f32.xlu1 %v1191_v31 }
  0x9c   :  { %v158_v32 = vpop.f32.mrf.mxu3 }
  0x9d   :  { %v186_v60 = vmul.f32 2.0, %v158_v32 }
  0x9e   :  { %v134_v33 = vpop.f32.mrf.mxu0 }
  0x9f   :  { %v178_v34 = vmul.f32 2.0, %v134_v33  ;;  %v1209_v62 = vsub.f32 %v985_v27, %v186_v60 }
  0xa1   :  { %v1194_v35 = vsub.f32 %v985_v27, %v178_v34 }
  0xa3   :  { %215 = vmin.xlane.f32.xlu2 %v1194_v35 }
  0xa4   :  { %v161_v36 = vpop.f32.mrf.mxu3 }
  0xa5   :  { %v187_v37 = vmul.f32 2.0, %v161_v36 }
  0xa6   :  { %v137_v38 = vpop.f32.mrf.mxu0 }
  0xa7   :  { %v1197_v39 = vsub.f32 %v985_v27, %v187_v37  ;;  %v179_v61 = vmul.f32 2.0, %v137_v38 }
  0xa9   :  { %v198_v63 = vsub.f32 %v985_v27, %v179_v61 }
  0xab   :  { %233 = vmin.xlane.f32.xlu2 %v1197_v39 }
  0xac   :  { %v164_v40 = vpop.f32.mrf.mxu3 }
  0xad   :  { %v188_v0 = vmul.f32 2.0, %v164_v40 }
  0xae   :  { %v140_v41 = vpop.f32.mrf.mxu0 }
  0xaf   :  { %v180_v1 = vmul.f32 2.0, %v140_v41  ;;  %v1212_v2 = vsub.f32 %v985_v27, %v188_v0 }
  0xb1   :  { %v1214_v3 = vsub.f32 %v985_v27, %v180_v1 }
  0xb4   :  { %v167_v42 = vpop.f32.mrf.mxu3 }
  0xb5   :  { %v189_v48 = vmul.f32 2.0, %v167_v42 }
  0xb6   :  { %v143_v43 = vpop.f32.mrf.mxu0 }
  0xb7   :  { %v1203_v49 = vsub.f32 %v985_v27, %v189_v48  ;;  %v181_v4 = vmul.f32 2.0, %v143_v43 }
  0xb9   :  { %v1218_v6 = vsub.f32 %v985_v27, %v181_v4 }
  0xbc   :  { %v170_v44 = vpop.f32.mrf.mxu3 }
  0xbd   :  { %v190_v45 = vmul.f32 2.0, %v170_v44 }
  0xbe   :  { %v146_v46 = vpop.f32.mrf.mxu0 }
  0xbf   :  { %v1200_v47 = vsub.f32 %v985_v27, %v190_v45  ;;  %v182_v53 = vmul.f32 2.0, %v146_v46 }
  0xc1   :  { %239 = vmin.xlane.f32.xlu2 %v1200_v47  ;;  %v1206_v57 = vsub.f32 %v985_v27, %v182_v53 }
  0xc4   :  { %v173_v5 = vpop.f32.mrf.mxu3 }
  0xc5   :  { %v191_v7 = vmul.f32 2.0, %v173_v5 }
  0xc6   :  { %v149_v50 = vpop.f32.mrf.mxu0 }
  0xc7   :  { %v183_v51 = vmul.f32 2.0, %v149_v50  ;;  %v1221_v24 = vsub.f32 %v985_v27, %v191_v7 }
  0xc9   :  { %237 = vmin.xlane.f32.xlu2 %v1203_v49  ;;  %v202_v52 = vsub.f32 %v985_v27, %v183_v51 }
  0xcb   :  { %225 = vmin.xlane.f32.xlu0 %v202_v52 }
  0xce   :  { %v152_v55 = vpop.f32.mrf.mxu0 }
  0xcf   :  { %v184_v56 = vmul.f32 2.0, %v152_v55 }
  0xd1   :  { %223 = vmin.xlane.f32.xlu2 %v1206_v57  ;;  %v203_v59 = vsub.f32 %v985_v27, %v184_v56 }
  0xd3   :  { %211 = vmin.xlane.f32.xlu0 %v195_v58  ;;  %227 = vmin.xlane.f32.xlu1 %v203_v59 }
  0xdb   :  { %231 = vmin.xlane.f32.xlu0 %v1209_v62  ;;  %217 = vmin.xlane.f32.xlu1 %v198_v63 }
  0xe3   :  { %219 = vmin.xlane.f32.xlu0 %v1214_v3  ;;  %235 = vmin.xlane.f32.xlu1 %v1212_v2 }
  0xeb   :  { %221 = vmin.xlane.f32.xlu0 %v1218_v6 }
  0xf3   :  { %241 = vmin.xlane.f32.xlu0 %v1221_v24 }
 0x10c   :  { %v1226_v28 = vpop.xlane.xlu2 %229 }
 0x10d   :  { %1804 = vst [vmem:[#allocation5_spill] sm:$0xff] %v1226_v28  ;;  %vm254_vm1 = vcmp.le.f32.partialorder %v1188_v30, %v1226_v28 }
 0x10e   :  { %v1231_v29 = vsel %vm254_vm1, %v1224_v26, 128  ;;  %v1248_v37 = vpop.xlane.xlu1 %213 }
 0x10f   :  { %v404_v32 = vshra.s32 %v1231_v29, 16  ;;  %vm246_vm8 = vcmp.le.f32.partialorder %v1191_v31, %v1248_v37 }
 0x111   :  { %v1234_v33 = vcvt.s32.f32 %v404_v32 }
 0x113   :  { %407 = vmin.xlane.f32.xlu2 %v1234_v33 }
 0x116   :  { %v1237_v27 = vpop.xlane.xlu2 %215 }
 0x117   :  { %vm247_vm2 = vcmp.le.f32.partialorder %v1194_v35, %v1237_v27 }
 0x118   :  { %v1242_v34 = vsel %vm247_vm2, %v1224_v26, 128 }
 0x119   :  { %v306_v36 = vshra.s32 %v1242_v34, 16 }
 0x11b   :  { %v1245_v30 = vcvt.s32.f32 %v306_v36 }
 0x11d   :  { %309 = vmin.xlane.f32.xlu0 %v1245_v30 }
 0x11e   :  { %v1252_v40 = vpop.xlane.xlu2 %233 }
 0x11f   :  { %1806 = vst [vmem:[#allocation7_spill] sm:$0xff] %v1252_v40  ;;  %vm256_vm5 = vcmp.le.f32.partialorder %v1197_v39, %v1252_v40 }
 0x120   :  { %v1276_v50 = vsel %vm256_vm5, %v1224_v26, 128 }
 0x121   :  { %v432_v55 = vshra.s32 %v1276_v50, 16 }
 0x123   :  { %v1302_v60 = vcvt.s32.f32 %v432_v55 }
 0x134   :  { %v1281_v53 = vpop.xlane.xlu2 %239 }
 0x135   :  { %1808 = vst [vmem:[#allocation9_spill] sm:$0xff] %v1281_v53  ;;  %vm259_vm9 = vcmp.le.f32.partialorder %v1200_v47, %v1281_v53 }
 0x136   :  { %v1310_v0 = vsel %vm259_vm9, %v1224_v26, 128 }
 0x137   :  { %v474_v4 = vshra.s32 %v1310_v0, 16 }
 0x139   :  { %v1331_v32 = vcvt.s32.f32 %v474_v4 }
 0x13e   :  { %v1250_v38 = vpop.xlane.xlu0 %225 }
 0x13f   :  { %1805 = vst [vmem:[#allocation6_spill] sm:$0xff] %v1250_v38  ;;  %vm252_vm6 = vcmp.le.f32.partialorder %v202_v52, %v1250_v38  ;;  %v403_v38 = vand.u32 65535, %v1231_v29 }
 0x140   :  { %v1279_v51 = vsel %vm252_vm6, %v1224_v26, 128 }
 0x141   :  { %v376_v54 = vshra.s32 %v1279_v51, 16 }
 0x146   :  { %v1254_v41 = vpop.xlane.xlu0 %211  ;;  %v1256_v42 = vpop.xlane.xlu1 %227 }
 0x147   :  { %1807 = vst [vmem:[#allocation8_spill] sm:$0xff] %v1256_v42  ;;  %vm245_vm3 = vcmp.le.f32.partialorder %v195_v58, %v1254_v41  ;;  %vm253_vm4 = vcmp.le.f32.partialorder %v203_v59, %v1256_v42  ;;  %v1300_v59 = vcvt.s32.f32 %v376_v54 }
 0x148   :  { %v1261_v35 = vsel %vm245_vm3, %v1224_v26, 128  ;;  %v1264_v43 = vsel %vm253_vm4, %v1224_v26, 128 }
 0x149   :  { %v278_v44 = vshra.s32 %v1261_v35, 16  ;;  %v390_v45 = vshra.s32 %v1264_v43, 16  ;;  %v277_v40 = vand.u32 65535, %v1261_v35  ;;  %v389_v29 = vand.u32 65535, %v1264_v43 }
 0x14b   :  { %v1271_v46 = vcvt.s32.f32 %v278_v44  ;;  %v1273_v48 = vcvt.s32.f32 %v390_v45 }
 0x14d   :  { %281 = vmin.xlane.f32.xlu1 %v1271_v46  ;;  %393 = vmin.xlane.f32.xlu0 %v1273_v48 }
 0x14e   :  { %v1285_v39 = vpop.xlane.xlu0 %231  ;;  %v1287_v52 = vpop.xlane.xlu1 %217 }
 0x14f   :  { %1809 = vst [vmem:[#allocation10_spill] sm:$0xff] %v1285_v39  ;;  %vm248_vm7 = vcmp.le.f32.partialorder %v198_v63, %v1287_v52  ;;  %v1307_v63 = vsel %vm246_vm8, %v1224_v26, 128  ;;  %vm255_vm11 = vcmp.le.f32.partialorder %v1209_v62, %v1285_v39 }
 0x150   :  { %v1293_v56 = vsel %vm248_vm7, %v1224_v26, 128  ;;  %v292_v1 = vshra.s32 %v1307_v63, 16 }
 0x151   :  { %v320_v58 = vshra.s32 %v1293_v56, 16 }
 0x152   :  { %v1329_v25 = vcvt.s32.f32 %v292_v1  ;;  %v1356_v1 = vpop.xlane.xlu2 %237 }
 0x153   :  { %v1304_v61 = vcvt.s32.f32 %v320_v58  ;;  %1813 = vst [vmem:[#allocation14_spill] sm:$0xff] %v1356_v1  ;;  %vm258_vm15 = vcmp.le.f32.partialorder %v1203_v49, %v1356_v1 }
 0x155   :  { %379 = vmin.xlane.f32.xlu1 %v1300_v59  ;;  %435 = vmin.xlane.f32.xlu0 %v1302_v60 }
 0x156   :  { %323 = vmin.xlane.f32.xlu2 %v1304_v61  ;;  %v1315_v31 = vpop.xlane.xlu0 %219  ;;  %v1317_v47 = vpop.xlane.xlu1 %235 }
 0x157   :  { %1810 = vst [vmem:[#allocation11_spill] sm:$0xff] %v1315_v31  ;;  %vm257_vm10 = vcmp.le.f32.partialorder %v1212_v2, %v1317_v47  ;;  %v1336_v2 = vsel %vm255_vm11, %v1224_v26, 128  ;;  %vm249_vm13 = vcmp.le.f32.partialorder %v1214_v3, %v1315_v31 }
 0x158   :  { %1811 = vst [vmem:[#allocation12_spill] sm:$0xff] %v1317_v47  ;;  %v1324_v5 = vsel %vm257_vm10, %v1224_v26, 128  ;;  %v418_v62 = vshra.s32 %v1336_v2, 16  ;;  %v1359_v4 = vsel %vm249_vm13, %v1224_v26, 128  ;;  %v1379_v47 = vsel %vm258_vm15, %v1224_v26, 128 }
 0x159   :  { %v446_v7 = vshra.s32 %v1324_v5, 16  ;;  %v334_v3 = vshra.s32 %v1359_v4, 16 }
 0x15a   :  { %v1352_v55 = vcvt.s32.f32 %v418_v62 }
 0x15b   :  { %v1333_v36 = vcvt.s32.f32 %v446_v7 }
 0x15d   :  { %295 = vmin.xlane.f32.xlu1 %v1329_v25  ;;  %477 = vmin.xlane.f32.xlu0 %v1331_v32 }
 0x15e   :  { %449 = vmin.xlane.f32.xlu2 %v1333_v36  ;;  %v1341_v44 = vpop.xlane.xlu0 %221 }
 0x15f   :  { %1812 = vst [vmem:[#allocation13_spill] sm:$0xff] %v1341_v44  ;;  %vm250_vm12 = vcmp.le.f32.partialorder %v1218_v6, %v1341_v44  ;;  %v405_v44 = vcvt.s32.f32 %v403_v38 }
 0x160   :  { %v1347_v45 = vsel %vm250_vm12, %v1224_v26, 128 }
 0x161   :  { %v348_v54 = vshra.s32 %v1347_v45, 16 }
 0x163   :  { %v1354_v58 = vcvt.s32.f32 %v348_v54  ;;  %v1374_v54 = vcvt.s32.f32 %v334_v3 }
 0x165   :  { %421 = vmin.xlane.f32.xlu1 %v1352_v55 }
 0x166   :  { %351 = vmin.xlane.f32.xlu2 %v1354_v58  ;;  %v1363_v6 = vpop.xlane.xlu0 %241 }
 0x167   :  { %1814 = vst [vmem:[#allocation15_spill] sm:$0xff] %v1363_v6  ;;  %vm260_vm14 = vcmp.le.f32.partialorder %v1221_v24, %v1363_v6  ;;  %v1382_v24 = vpop.xlane.xlu2 %223  ;;  %v460_v6 = vshra.s32 %v1379_v47, 16 }
 0x168   :  { %v1369_v7 = vsel %vm260_vm14, %v1224_v26, 128  ;;  %1815 = vst [vmem:[#allocation16_spill] sm:$0xff] %v1382_v24  ;;  %vm251_vm1 = vcmp.le.f32.partialorder %v1206_v57, %v1382_v24  ;;  %v279_v57 = vcvt.s32.f32 %v277_v40 }
 0x169   :  { %v488_v62 = vshra.s32 %v1369_v7, 16  ;;  %v1388_v49 = vcvt.s32.f32 %v460_v6  ;;  %v1391_v3 = vsel %vm251_vm1, %v1224_v26, 128 }
 0x16b   :  { %v1376_v53 = vcvt.s32.f32 %v488_v62  ;;  %v362_v62 = vshra.s32 %v1391_v3, 16 }
 0x16d   :  { %337 = vmin.xlane.f32.xlu1 %v1374_v54  ;;  %v1395_v1 = vcvt.s32.f32 %v362_v62  ;;  %v375_v62 = vand.u32 65535, %v1279_v51  ;;  %v305_v51 = vand.u32 65535, %v1242_v34 }
 0x16e   :  { %491 = vmin.xlane.f32.xlu2 %v1376_v53 }
 0x16f   :  { %v377_v40 = vcvt.s32.f32 %v375_v62 }
 0x175   :  { %463 = vmin.xlane.f32.xlu1 %v1388_v49 }
 0x17d   :  { %365 = vmin.xlane.f32.xlu1 %v1395_v1 }
 0x186   :  { %v1403_v6 = vpop.xlane.xlu2 %407 }
 0x187   :  { %vm409_vm3 = vcmp.eq.f32.partialorder %v1234_v33, %v1403_v6  ;;  %v291_v33 = vand.u32 65535, %v1307_v63 }
 0x190   :  { %v1399_v39 = vpop.xlane.xlu0 %309 }
 0x191   :  { %vm311_vm6 = vcmp.eq.f32.partialorder %v1245_v30, %v1399_v39  ;;  %v319_v30 = vand.u32 65535, %v1293_v56 }
 0x1c0   :  { %v1401_v28 = vpop.xlane.xlu1 %281  ;;  %v1411_v35 = vpop.xlane.xlu0 %393 }
 0x1c1   :  { %vm283_vm2 = vcmp.eq.f32.partialorder %v1271_v46, %v1401_v28  ;;  %v410_v46 = vsel %vm409_vm3, %v405_v44, inf  ;;  %vm395_vm5 = vcmp.eq.f32.partialorder %v1273_v48, %v1411_v35  ;;  %v293_v44 = vcvt.s32.f32 %v291_v33 }
 0x1c2   :  { %v284_v42 = vsel %vm283_vm2, %v279_v57, inf  ;;  %v391_v57 = vcvt.s32.f32 %v389_v29  ;;  %v431_v48 = vand.u32 65535, %v1276_v50  ;;  %vm793_vm3 = vcmask 7168  }
 0x1c3   :  { %285 = vmin.xlane.f32.xlu0 %v284_v42 }
 0x1c4   :  { %v396_v34 = vsel %vm395_vm5, %v391_v57, inf  ;;  %v433_v29 = vcvt.s32.f32 %v431_v48 }
 0x1c8   :  { %v1413_v24 = vpop.xlane.xlu1 %379  ;;  %v1432_v43 = vpop.xlane.xlu0 %435 }
 0x1c9   :  { %v1415_v31 = vpop.xlane.xlu2 %323  ;;  %vm381_vm4 = vcmp.eq.f32.partialorder %v1300_v59, %v1413_v24  ;;  %v307_v59 = vcvt.s32.f32 %v305_v51  ;;  %vm437_vm9 = vcmp.eq.f32.partialorder %v1302_v60, %v1432_v43  ;;  %v445_v60 = vand.u32 65535, %v1324_v5 }
 0x1ca   :  { %v382_v42 = vsel %vm381_vm4, %v377_v40, inf  ;;  %vm325_vm8 = vcmp.eq.f32.partialorder %v1304_v61, %v1415_v31  ;;  %v438_v50 = vsel %vm437_vm9, %v433_v29, inf  ;;  %v473_v61 = vand.u32 65535, %v1310_v0 }
 0x1cb   :  { %411 = vmin.xlane.f32.xlu0 %v410_v46  ;;  %383 = vmin.xlane.f32.xlu1 %v382_v42  ;;  %v312_v63 = vsel %vm311_vm6, %v307_v59, inf  ;;  %v417_v46 = vand.u32 65535, %v1336_v2  ;;  %v321_v42 = vcvt.s32.f32 %v319_v30  ;;  %v333_v59 = vand.u32 65535, %v1359_v4 }
 0x1cc   :  { %v347_v4 = vand.u32 65535, %v1347_v45  ;;  %v698_v45 = vmul.f32 %v1090_v10, %v1090_v10  ;;  %v700_v10 = vmul.f32 %v1118_v14, %v1118_v14  ;;  %v52_v14 = vld [vmem:[%s1786_s1 + $0x78] sm:$0xff] }
 0x1cd   :  { %v419_v51 = vcvt.s32.f32 %v417_v46  ;;  %v326_v56 = vsel %vm325_vm8, %v321_v42, inf  ;;  %549 = vmatpush.msra.mxu1 %v52_v14  ;;  %949 = vmatpush.msra.mxu2 %v52_v14 }
 0x1ce   :  { %v349_v42 = vcvt.s32.f32 %v347_v4  ;;  %950 = vmatpush.msrb.mxu3 %v52_v14  ;;  %v46_v4 = vld [vmem:[%s1786_s1 + $0x48] sm:$0xff]  ;;  %v1012_v14 = vmov 1.0  }
 0x1d0   :  { %v1426_v38 = vpop.xlane.xlu1 %295  ;;  %v1447_v2 = vpop.xlane.xlu0 %477 }
 0x1d1   :  { %v1428_v62 = vpop.xlane.xlu2 %449  ;;  %vm297_vm7 = vcmp.eq.f32.partialorder %v1329_v25, %v1426_v38  ;;  %vm479_vm12 = vcmp.eq.f32.partialorder %v1331_v32, %v1447_v2  ;;  %v459_v32 = vand.u32 65535, %v1379_v47 }
 0x1d2   :  { %v298_v40 = vsel %vm297_vm7, %v293_v44, inf  ;;  %vm451_vm11 = vcmp.eq.f32.partialorder %v1333_v36, %v1428_v62  ;;  %v447_v44 = vcvt.s32.f32 %v445_v60  ;;  %v487_v36 = vand.u32 65535, %v1369_v7 }
 0x1d3   :  { %397 = vmin.xlane.f32.xlu0 %v396_v34  ;;  %313 = vmin.xlane.f32.xlu1 %v312_v63  ;;  %v475_v34 = vcvt.s32.f32 %v473_v61  ;;  %v335_v63 = vcvt.s32.f32 %v333_v59  ;;  %v461_v46 = vcvt.s32.f32 %v459_v32  ;;  %v722_v61 = vsel %vm62_vm0, %v700_v10, 0.0  ;;  %v47_v32 = vld [vmem:[%s1786_s1 + $0x50] sm:$0xff] }
 0x1d4   :  { %299 = vmin.xlane.f32.xlu2 %v298_v40  ;;  %v452_v40 = vsel %vm451_vm11, %v447_v44, inf  ;;  %v702_v44 = vmul.f32 %v1146_v18, %v1146_v18  ;;  %v49_v18 = vld [vmem:[%s1786_s1 + $0x60] sm:$0xff]  ;;  %v288_v10 = vcvt.f32.s32 %v1401_v28 }
 0x1d5   :  { %v480_v5 = vsel %vm479_vm12, %v475_v34, inf }
 0x1d8   :  { %v1441_v25 = vpop.xlane.xlu1 %421 }
 0x1d9   :  { %vm423_vm10 = vcmp.eq.f32.partialorder %v1352_v55, %v1441_v25  ;;  %v1445_v33 = vpop.xlane.xlu2 %351 }
 0x1da   :  { %v424_v57 = vsel %vm423_vm10, %v419_v51, inf  ;;  %vm353_vm15 = vcmp.eq.f32.partialorder %v1354_v58, %v1445_v33  ;;  %v697_v58 = vmul.f32 %v1076_v8, %v1076_v8 }
 0x1db   :  { %327 = vmin.xlane.f32.xlu0 %v326_v56  ;;  %439 = vmin.xlane.f32.xlu1 %v438_v50  ;;  %v354_v47 = vsel %vm353_vm15, %v349_v42, inf  ;;  %v716_v56 = vsel %vm62_vm0, %v698_v45, 0.0  ;;  %v710_v42 = vmul.f32 %v1137_v17, %v1137_v17  ;;  %v41_v45 = vld [vmem:[%s1786_s1 + $0x20] sm:$0xff] }
 0x1dc   :  { %425 = vmin.xlane.f32.xlu2 %v424_v57  ;;  %v361_v57 = vand.u32 65535, %v1391_v3  ;;  %v703_v3 = vmul.f32 %v1160_v20, %v1160_v20 }
 0x1dd   :  { %v752_v17 = vsel %vm62_vm0, %v710_v42, 0.0  ;;  %v330_v42 = vcvt.f32.s32 %v1415_v31 }
 0x1de   :  { %v363_v60 = vcvt.s32.f32 %v361_v57  ;;  %v731_v34 = vsel %vm62_vm0, %v703_v3, 0.0  ;;  %v386_v3 = vcvt.f32.s32 %v1413_v24  ;;  %v316_v24 = vcvt.f32.s32 %v1399_v39 }
 0x1e0   :  { %v1456_v55 = vpop.xlane.xlu1 %337 }
 0x1e1   :  { %vm339_vm13 = vcmp.eq.f32.partialorder %v1374_v54, %v1456_v55  ;;  %v1460_v0 = vpop.xlane.xlu2 %491  ;;  %v489_v54 = vcvt.s32.f32 %v487_v36  ;;  %v705_v36 = vmul.f32 %v1181_v23, %v1181_v23 }
 0x1e2   :  { %v340_v30 = vsel %vm339_vm13, %v335_v63, inf  ;;  %vm493_vm14 = vcmp.eq.f32.partialorder %v1376_v53, %v1460_v0  ;;  %v699_v53 = vmul.f32 %v1104_v12, %v1104_v12  ;;  %v701_v12 = vmul.f32 %v1132_v16, %v1132_v16 }
 0x1e3   :  { %453 = vmin.xlane.f32.xlu0 %v452_v40  ;;  %481 = vmin.xlane.f32.xlu1 %v480_v5  ;;  %v494_v29 = vsel %vm493_vm14, %v489_v54, inf  ;;  %v704_v16 = vmul.f32 %v1174_v22, %v1174_v22  ;;  %v50_v22 = vld [vmem:[%s1786_s1 + $0x68] sm:$0xff]  ;;  %v728_v63 = vsel %vm62_vm0, %v702_v44, 0.0  ;;  %v48_v40 = vld [vmem:[%s1786_s1 + $0x58] sm:$0xff]  ;;  %v707_v5 = vmul.f32 %v1095_v11, %v1095_v11  ;;  %v45_v54 = vld [vmem:[%s1786_s1 + $0x40] sm:$0xff] }
 0x1e4   :  { %341 = vmin.xlane.f32.xlu2 %v340_v30  ;;  %v719_v51 = vsel %vm62_vm0, %v699_v53, 0.0  ;;  %v725_v8 = vsel %vm62_vm0, %v701_v12, 0.0  ;;  %v706_v30 = vmul.f32 %v1081_v9, %v1081_v9  ;;  %v737_v23 = vsel %vm62_vm0, %v705_v36, 0.0  ;;  %v42_v53 = vld [vmem:[%s1786_s1 + $0x28] sm:$0xff] }
 0x1e5   :  { %v734_v20 = vsel %vm62_vm0, %v704_v16, 0.0  ;;  %v743_v11 = vsel %vm62_vm0, %v707_v5, 0.0  ;;  %v414_v16 = vcvt.f32.s32 %v1403_v6 }
 0x1e6   :  { %v740_v9 = vsel %vm62_vm0, %v706_v30, 0.0  ;;  %v317_v30 = vshll.u32 %v316_v24, 16 }
 0x1e7   :  { %v415_v44 = vshll.u32 %v414_v16, 16 }
 0x1e8   :  { %v1467_v48 = vpop.xlane.xlu1 %463 }
 0x1e9   :  { %vm465_vm1 = vcmp.eq.f32.partialorder %v1388_v49, %v1467_v48  ;;  %v713_v49 = vsel %vm62_vm0, %v697_v58, 0.0  ;;  %v40_v58 = vld [vmem:[%s1786_s1 + $0x18] sm:$0xff] }
 0x1ea   :  { %v466_v7 = vsel %vm465_vm1, %v461_v46, inf  ;;  %v44_v46 = vld [vmem:[%s1786_s1 + $0x38] sm:$0xff] }
 0x1eb   :  { %495 = vmin.xlane.f32.xlu1 %v494_v29  ;;  %467 = vmin.xlane.f32.xlu0 %v466_v7  ;;  %v709_v29 = vmul.f32 %v1123_v15, %v1123_v15  ;;  %v708_v7 = vmul.f32 %v1109_v13, %v1109_v13 }
 0x1ec   :  { %355 = vmin.xlane.f32.xlu2 %v354_v47  ;;  %v43_v47 = vld [vmem:[%s1786_s1 + $0x30] sm:$0xff] }
 0x1ed   :  { %v749_v15 = vsel %vm62_vm0, %v709_v29, 0.0  ;;  %v746_v13 = vsel %vm62_vm0, %v708_v7, 0.0  ;;  %v428_v29 = vcvt.f32.s32 %v1441_v25  ;;  %v331_v25 = vshll.u32 %v330_v42, 16 }
 0x1f0   :  { %v1482_v50 = vpop.xlane.xlu1 %365 }
 0x1f1   :  { %vm367_vm2 = vcmp.eq.f32.partialorder %v1395_v1, %v1482_v50  ;;  %v51_v1 = vld [vmem:[%s1786_s1 + $0x70] sm:$0xff] }
 0x1f2   :  { %v368_v59 = vsel %vm367_vm2, %v363_v60, inf  ;;  %550 = vmatpush.msra.mxu1 %v51_v1  ;;  %951 = vmatpush.msra.mxu2 %v51_v1  ;;  %v289_v60 = vshll.u32 %v288_v10, 16 }
 0x1f3   :  { %720 = vadd.xlane.f32.xlu1 %v719_v51  ;;  %717 = vadd.xlane.f32.xlu0 %v716_v56  ;;  %v712_v51 = vmul.f32 %v1165_v21, %v1165_v21  ;;  %v711_v56 = vmul.f32 %v1151_v19, %v1151_v19  ;;  %v38_v21 = vld [vmem:[%s1786_s1 + $0x8] sm:$0xff]  ;;  %v37_v19 = vld [vmem:[%s1786_s1] sm:$0xff] }
 0x1f4   :  { %714 = vadd.xlane.f32.xlu2 %v713_v49  ;;  %952 = vmatpush.msrb.mxu3 %v51_v1  ;;  %v39_v49 = vld [vmem:[%s1786_s1 + $0x10] sm:$0xff] }
 0x1f5   :  { %551 = vmatpush.msra.mxu1 %v50_v22  ;;  %953 = vmatpush.msra.mxu2 %v50_v22  ;;  %v758_v12 = vsel %vm62_vm0, %v712_v51, 0.0  ;;  %v755_v57 = vsel %vm62_vm0, %v711_v56, 0.0  ;;  %v484_v56 = vcvt.f32.s32 %v1447_v2 }
 0x1f6   :  { %954 = vmatpush.msrb.mxu3 %v50_v22  ;;  %v387_v22 = vshll.u32 %v386_v3, 16  ;;  %v498_v3 = vcvt.f32.s32 %v1460_v0 }
 0x1f7   :  { %552 = vmatpush.msra.mxu1 %v49_v18  ;;  %955 = vmatpush.msra.mxu2 %v49_v18 }
 0x1f8   :  { %956 = vmatpush.msrb.mxu3 %v49_v18  ;;  %v400_v18 = vcvt.f32.s32 %v1411_v35 }
 0x1f9   :  { %553 = vmatpush.msra.mxu1 %v48_v40  ;;  %957 = vmatpush.msra.mxu2 %v48_v40 }
 0x1fa   :  { %958 = vmatpush.msrb.mxu3 %v48_v40  ;;  %v302_v40 = vcvt.f32.s32 %v1426_v38  ;;  %v401_v35 = vshll.u32 %v400_v18, 16  ;;  %v442_v38 = vcvt.f32.s32 %v1432_v43 }
 0x1fb   :  { %726 = vadd.xlane.f32.xlu1 %v725_v8  ;;  %369 = vmin.xlane.f32.xlu0 %v368_v59 }
 0x1fc   :  { %723 = vadd.xlane.f32.xlu2 %v722_v61  ;;  %554 = vmatpush.msra.mxu1 %v47_v32  ;;  %v443_v7 = vshll.u32 %v442_v38, 16 }
 0x1fd   :  { %959 = vmatpush.msra.mxu2 %v47_v32  ;;  %960 = vmatpush.msrb.mxu3 %v47_v32 }
 0x1fe   :  { %555 = vmatpush.msra.mxu1 %v46_v4 }
 0x1ff   :  { %961 = vmatpush.msra.mxu2 %v46_v4  ;;  %962 = vmatpush.msrb.mxu3 %v46_v4 }
 0x200   :  { %556 = vmatpush.msra.mxu1 %v45_v54 }
 0x201   :  { %963 = vmatpush.msra.mxu2 %v45_v54  ;;  %964 = vmatpush.msrb.mxu3 %v45_v54 }
 0x202   :  { %557 = vmatpush.msra.mxu1 %v44_v46 }
 0x203   :  { %735 = vadd.xlane.f32.xlu1 %v734_v20  ;;  %732 = vadd.xlane.f32.xlu0 %v731_v34 }
 0x204   :  { %729 = vadd.xlane.f32.xlu2 %v728_v63  ;;  %558 = vmatpush.msra.mxu1 %v43_v47 }
 0x205   :  { %965 = vmatpush.msra.mxu2 %v44_v46  ;;  %966 = vmatpush.msrb.mxu3 %v44_v46 }
 0x206   :  { %559 = vmatpush.msra.mxu1 %v42_v53 }
 0x207   :  { %967 = vmatpush.msra.mxu2 %v43_v47  ;;  %968 = vmatpush.msrb.mxu3 %v43_v47 }
 0x208   :  { %560 = vmatpush.msra.mxu1 %v41_v45 }
 0x209   :  { %969 = vmatpush.msra.mxu2 %v42_v53  ;;  %970 = vmatpush.msrb.mxu3 %v42_v53 }
 0x20a   :  { %561 = vmatpush.msra.mxu1 %v40_v58 }
 0x20b   :  { %744 = vadd.xlane.f32.xlu1 %v743_v11  ;;  %741 = vadd.xlane.f32.xlu0 %v740_v9  ;;  %v303_v11 = vshll.u32 %v302_v40, 16 }
 0x20c   :  { %738 = vadd.xlane.f32.xlu2 %v737_v23  ;;  %562 = vmatpush.msra.mxu1 %v39_v49 }
 0x20d   :  { %971 = vmatpush.msra.mxu2 %v41_v45  ;;  %972 = vmatpush.msrb.mxu3 %v41_v45 }
 0x20e   :  { %563 = vmatpush.msra.mxu1 %v38_v21 }
 0x20f   :  { %973 = vmatpush.msra.mxu2 %v40_v58  ;;  %974 = vmatpush.msrb.mxu3 %v40_v58 }
 0x210   :  { %564 = vmatpush.msra.mxu1 %v37_v19 }
 0x211   :  { %975 = vmatpush.msra.mxu2 %v39_v49  ;;  %976 = vmatpush.msrb.mxu3 %v39_v49  ;;  %v456_v49 = vcvt.f32.s32 %v1428_v62 }
 0x213   :  { %753 = vadd.xlane.f32.xlu1 %v752_v17  ;;  %750 = vadd.xlane.f32.xlu0 %v749_v15  ;;  %v429_v15 = vshll.u32 %v428_v29, 16 }
 0x214   :  { %747 = vadd.xlane.f32.xlu2 %v746_v13  ;;  %977 = vmatpush.msra.mxu2 %v38_v21 }
 0x215   :  { %978 = vmatpush.msrb.mxu3 %v38_v21 }
 0x216   :  { %979 = vmatpush.msra.mxu2 %v37_v19 }
 0x217   :  { %980 = vmatpush.msrb.mxu3 %v37_v19 }
 0x21b   :  { %759 = vadd.xlane.f32.xlu0 %v758_v12  ;;  %v344_v12 = vcvt.f32.s32 %v1456_v55  ;;  %v457_v55 = vshll.u32 %v456_v49, 16 }
 0x21c   :  { %756 = vadd.xlane.f32.xlu2 %v755_v57  ;;  %v485_v57 = vshll.u32 %v484_v56, 16 }
 0x236   :  { %v286_v8 = vpop.xlane.xlu0 %285 }
 0x237   :  { %v287_v61 = vcvt.f32.s32 %v286_v8  ;;  %v345_v8 = vshll.u32 %v344_v12, 16  ;;  %v1819_v12 = vld [vmem:[#allocation6_spill] sm:$0xff] }
 0x239   :  { %v290_v59 = vadd.s32 %v289_v60, %v287_v61 }
 0x23b   :  { %837 = vst.msk [vmem:[%s1789_s4] sm:$0xff] %vm793_vm3, %v290_v59  ;;  %vm501_vm4 = vcmp.eq.s32.totalorder %v1224_v26, %v290_v59 }
 0x23c   :  { %925 = vmatmul.msk.f32.vlgmr.msra.gmra.mxu1 %vm501_vm4, %v1012_v14 }
 0x23e   :  { %v412_v28 = vpop.xlane.xlu0 %411  ;;  %v384_v1 = vpop.xlane.xlu1 %383 }
 0x23f   :  { %v413_v20 = vcvt.f32.s32 %v412_v28  ;;  %v385_v34 = vcvt.f32.s32 %v384_v1  ;;  %v470_v28 = vcvt.f32.s32 %v1467_v48  ;;  %v358_v1 = vcvt.f32.s32 %v1445_v33 }
 0x240   :  { %v499_v48 = vshll.u32 %v498_v3, 16 }
 0x241   :  { %v416_v63 = vadd.s32 %v415_v44, %v413_v20  ;;  %v388_v6 = vadd.s32 %v387_v22, %v385_v34  ;;  %v471_v44 = vshll.u32 %v470_v28, 16  ;;  %v1822_v28 = vld [vmem:[#allocation10_spill] sm:$0xff] }
 0x243   :  { %846 = vst.msk [vmem:[%s1789_s4 + $0x48] sm:$0xff] %vm793_vm3, %v416_v63  ;;  %vm508_vm5 = vcmp.eq.s32.totalorder %v1224_v26, %v388_v6  ;;  %vm510_vm8 = vcmp.eq.s32.totalorder %v1224_v26, %v416_v63  ;;  %v359_v63 = vshll.u32 %v358_v1, 16 }
 0x244   :  { %844 = vst.msk [vmem:[%s1789_s4 + $0x38] sm:$0xff] %vm793_vm3, %v388_v6  ;;  %932 = vmatmul.msk.f32.vlgmr.msra.gmra.mxu2 %vm508_vm5, %v1012_v14 }
 0x246   :  { %v398_v5 = vpop.xlane.xlu0 %397  ;;  %v314_v39 = vpop.xlane.xlu1 %313 }
 0x247   :  { %v399_v36 = vcvt.f32.s32 %v398_v5  ;;  %v300_v32 = vpop.xlane.xlu2 %299  ;;  %v315_v4 = vcvt.f32.s32 %v314_v39 }
 0x248   :  { %v301_v9 = vcvt.f32.s32 %v300_v32  ;;  %v372_v32 = vcvt.f32.s32 %v1482_v50 }
 0x249   :  { %v402_v23 = vadd.s32 %v401_v35, %v399_v36  ;;  %v318_v54 = vadd.s32 %v317_v30, %v315_v4 }
 0x24a   :  { %v304_v46 = vadd.s32 %v303_v11, %v301_v9 }
 0x24b   :  { %845 = vst.msk [vmem:[%s1789_s4 + $0x40] sm:$0xff] %vm793_vm3, %v402_v23  ;;  %vm509_vm6 = vcmp.eq.s32.totalorder %v1224_v26, %v402_v23  ;;  %vm503_vm9 = vcmp.eq.s32.totalorder %v1224_v26, %v318_v54 }
 0x24c   :  { %838 = vst.msk [vmem:[%s1789_s4 + $0x8] sm:$0xff] %vm793_vm3, %v304_v46  ;;  %vm502_vm7 = vcmp.eq.s32.totalorder %v1224_v26, %v304_v46  ;;  %933 = vmatmul.msk.f32.gmra.mxu2 %vm509_vm6, %v1012_v14 }
 0x24d   :  { %839 = vst.msk [vmem:[%s1789_s4 + $0x10] sm:$0xff] %vm793_vm3, %v318_v54  ;;  %926 = vmatmul.msk.f32.gmra.mxu1 %vm502_vm7, %v1012_v14  ;;  %v373_v54 = vshll.u32 %v372_v32, 16 }
 0x24e   :  { %v328_v31 = vpop.xlane.xlu0 %327  ;;  %v440_v43 = vpop.xlane.xlu1 %439 }
 0x24f   :  { %v329_v47 = vcvt.f32.s32 %v328_v31  ;;  %v426_v53 = vpop.xlane.xlu2 %425  ;;  %v441_v17 = vcvt.f32.s32 %v440_v43 }
 0x250   :  { %v427_v13 = vcvt.f32.s32 %v426_v53 }
 0x251   :  { %v332_v45 = vadd.s32 %v331_v25, %v329_v47  ;;  %v444_v58 = vadd.s32 %v443_v7, %v441_v17 }
 0x252   :  { %v430_v51 = vadd.s32 %v429_v15, %v427_v13  ;;  %v1817_v15 = vld [vmem:[#allocation13_spill] sm:$0xff] }
 0x253   :  { %840 = vst.msk [vmem:[%s1789_s4 + $0x18] sm:$0xff] %vm793_vm3, %v332_v45  ;;  %vm504_vm12 = vcmp.eq.s32.totalorder %v1224_v26, %v332_v45  ;;  %vm512_vm13 = vcmp.eq.s32.totalorder %v1224_v26, %v444_v58  ;;  %v1818_v45 = vld [vmem:[#allocation16_spill] sm:$0xff] }
 0x254   :  { %847 = vst.msk [vmem:[%s1789_s4 + $0x50] sm:$0xff] %vm793_vm3, %v430_v51  ;;  %934 = vmatmul.msk.f32.gmra.mxu2 %vm510_vm8, %v1012_v14  ;;  %vm511_vm10 = vcmp.eq.s32.totalorder %v1224_v26, %v430_v51 }
 0x255   :  { %848 = vst.msk [vmem:[%s1789_s4 + $0x58] sm:$0xff] %vm793_vm3, %v444_v58  ;;  %927 = vmatmul.msk.f32.gmra.mxu1 %vm503_vm9, %v1012_v14 }
 0x256   :  { %v454_v62 = vpop.xlane.xlu0 %453  ;;  %v482_v2 = vpop.xlane.xlu1 %481 }
 0x257   :  { %v455_v21 = vcvt.f32.s32 %v454_v62  ;;  %v342_v19 = vpop.xlane.xlu2 %341  ;;  %v483_v10 = vcvt.f32.s32 %v482_v2 }
 0x258   :  { %v343_v60 = vcvt.f32.s32 %v342_v19  ;;  %v1820_v19 = vld [vmem:[#allocation8_spill] sm:$0xff] }
 0x259   :  { %v458_v61 = vadd.s32 %v457_v55, %v455_v21  ;;  %v486_v59 = vadd.s32 %v485_v57, %v483_v10 }
 0x25a   :  { %v346_v16 = vadd.s32 %v345_v8, %v343_v60  ;;  %v1821_v8 = vld [vmem:[#allocation5_spill] sm:$0xff] }
 0x25b   :  { %849 = vst.msk [vmem:[%s1789_s4 + $0x60] sm:$0xff] %vm793_vm3, %v458_v61  ;;  %vm515_vm11 = vcmp.eq.s32.totalorder %v1224_v26, %v486_v59  ;;  %vm513_vm1 = vcmp.eq.s32.totalorder %v1224_v26, %v458_v61 }
 0x25c   :  { %841 = vst.msk [vmem:[%s1789_s4 + $0x20] sm:$0xff] %vm793_vm3, %v346_v16  ;;  %935 = vmatmul.msk.f32.gmra.mxu2 %vm511_vm10, %v1012_v14  ;;  %939 = vmatmul.msk.f32.vlgmr.msrb.gmra.mxu3 %vm515_vm11, %v1012_v14  ;;  %vm505_vm15 = vcmp.eq.s32.totalorder %v1224_v26, %v346_v16 }
 0x25d   :  { %851 = vst.msk [vmem:[%s1789_s4 + $0x70] sm:$0xff] %vm793_vm3, %v486_v59  ;;  %928 = vmatmul.msk.f32.gmra.mxu1 %vm504_vm12, %v1012_v14 }
 0x25e   :  { %v468_v0 = vpop.xlane.xlu0 %467  ;;  %v496_v33 = vpop.xlane.xlu1 %495 }
 0x25f   :  { %v356_v22 = vpop.xlane.xlu2 %355  ;;  %v469_v20 = vcvt.f32.s32 %v468_v0  ;;  %v497_v34 = vcvt.f32.s32 %v496_v33 }
 0x260   :  { %v357_v6 = vcvt.f32.s32 %v356_v22  ;;  %v1823_v22 = vld [vmem:[#allocation7_spill] sm:$0xff] }
 0x261   :  { %v472_v24 = vadd.s32 %v471_v44, %v469_v20  ;;  %v500_v18 = vadd.s32 %v499_v48, %v497_v34  ;;  %v1824_v34 = vld [vmem:[#allocation12_spill] sm:$0xff] }
 0x262   :  { %v360_v40 = vadd.s32 %v359_v63, %v357_v6 }
 0x263   :  { %850 = vst.msk [vmem:[%s1789_s4 + $0x68] sm:$0xff] %vm793_vm3, %v472_v24  ;;  %vm516_vm14 = vcmp.eq.s32.totalorder %v1224_v26, %v500_v18  ;;  %vm514_vm5 = vcmp.eq.s32.totalorder %v1224_v26, %v472_v24 }
 0x264   :  { %842 = vst.msk [vmem:[%s1789_s4 + $0x28] sm:$0xff] %vm793_vm3, %v360_v40  ;;  %936 = vmatmul.msk.f32.gmra.mxu2 %vm512_vm13, %v1012_v14  ;;  %940 = vmatmul.msk.f32.gmra.mxu3 %vm516_vm14, %v1012_v14  ;;  %vm506_vm2 = vcmp.eq.s32.totalorder %v1224_v26, %v360_v40 }
 0x265   :  { %852 = vst.msk [vmem:[%s1789_s4 + $0x78] sm:$0xff] %vm793_vm3, %v500_v18  ;;  %929 = vmatmul.msk.f32.gmra.mxu1 %vm505_vm15, %v1012_v14 }
 0x266   :  { %v718_v5 = vpop.xlane.xlu0 %717  ;;  %v721_v39 = vpop.xlane.xlu1 %720 }
 0x267   :  { %v715_v30 = vpop.xlane.xlu2 %714  ;;  %v762_v36 = vadd.f32 %v718_v5, %v1248_v37  ;;  %v763_v9 = vadd.f32 %v721_v39, %v1237_v27  ;;  %v1816_v27 = vld [vmem:[#allocation11_spill] sm:$0xff]  ;;  %v1825_v39 = vld [vmem:[#allocation14_spill] sm:$0xff] }
 0x268   :  { %v761_v35 = vadd.f32 %v715_v30, %v1254_v41 }
 0x269   :  { %v795_v11 = vsel %vm793_vm3, %v762_v36, 0.0  ;;  %v797_v29 = vsel %vm793_vm3, %v763_v9, 0.0 }
 0x26a   :  { %v794_v4 = vsel %vm793_vm3, %v761_v35, 0.0 }
 0x26b   :  { %v796_v37 = vadd.f32 %v795_v11, %v794_v4  ;;  %v1826_v11 = vld [vmem:[#allocation9_spill] sm:$0xff] }
 0x26c   :  { %937 = vmatmul.msk.f32.gmra.mxu2 %vm513_vm1, %v1012_v14 }
 0x26d   :  { %930 = vmatmul.msk.f32.gmra.mxu1 %vm506_vm2, %v1012_v14  ;;  %v798_v43 = vadd.f32 %v797_v29, %v796_v37 }
 0x26e   :  { %v370_v23 = vpop.xlane.xlu0 %369  ;;  %v727_v41 = vpop.xlane.xlu1 %726 }
 0x26f   :  { %v724_v46 = vpop.xlane.xlu2 %723  ;;  %v371_v50 = vcvt.f32.s32 %v370_v23  ;;  %v765_v7 = vadd.f32 %v727_v41, %v1816_v27  ;;  %v1827_v23 = vld [vmem:[#allocation15_spill] sm:$0xff] }
 0x270   :  { %v764_v38 = vadd.f32 %v724_v46, %v1287_v52 }
 0x271   :  { %v374_v42 = vadd.s32 %v373_v54, %v371_v50  ;;  %v801_v17 = vsel %vm793_vm3, %v765_v7, 0.0 }
 0x272   :  { %v799_v31 = vsel %vm793_vm3, %v764_v38, 0.0 }
 0x273   :  { %843 = vst.msk [vmem:[%s1789_s4 + $0x30] sm:$0xff] %vm793_vm3, %v374_v42  ;;  %vm507_vm4 = vcmp.eq.s32.totalorder %v1224_v26, %v374_v42  ;;  %v800_v52 = vadd.f32 %v799_v31, %v798_v43 }
 0x274   :  { %938 = vmatmul.msk.f32.gmra.mxu2 %vm514_vm5, %v1012_v14 }
 0x275   :  { %931 = vmatmul.msk.f32.gmra.mxu1 %vm507_vm4, %v1012_v14  ;;  %v802_v51 = vadd.f32 %v801_v17, %v800_v52 }
 0x276   :  { %v733_v25 = vpop.xlane.xlu0 %732  ;;  %v736_v47 = vpop.xlane.xlu1 %735 }
 0x277   :  { %v730_v53 = vpop.xlane.xlu2 %729  ;;  %v767_v58 = vadd.f32 %v733_v25, %v1818_v45  ;;  %v768_v62 = vadd.f32 %v736_v47, %v1819_v12 }
 0x278   :  { %v766_v13 = vadd.f32 %v730_v53, %v1817_v15 }
 0x279   :  { %v805_v49 = vsel %vm793_vm3, %v767_v58, 0.0  ;;  %v807_v21 = vsel %vm793_vm3, %v768_v62, 0.0 }
 0x27a   :  { %v803_v56 = vsel %vm793_vm3, %v766_v13, 0.0 }
 0x27b   :  { %v804_v26 = vadd.f32 %v803_v56, %v802_v51 }
 0x27d   :  { %v806_v2 = vadd.f32 %v805_v49, %v804_v26 }
 0x27e   :  { %v742_v57 = vpop.xlane.xlu0 %741  ;;  %v745_v55 = vpop.xlane.xlu1 %744 }
 0x27f   :  { %v739_v14 = vpop.xlane.xlu2 %738  ;;  %v770_v60 = vadd.f32 %v742_v57, %v1821_v8  ;;  %v808_v61 = vadd.f32 %v807_v21, %v806_v2  ;;  %v771_v1 = vadd.f32 %v745_v55, %v1822_v28 }
 0x280   :  { %v769_v10 = vadd.f32 %v739_v14, %v1820_v19 }
 0x281   :  { %v811_v3 = vsel %vm793_vm3, %v770_v60, 0.0  ;;  %v813_v44 = vsel %vm793_vm3, %v771_v1, 0.0 }
 0x282   :  { %v809_v59 = vsel %vm793_vm3, %v769_v10, 0.0 }
 0x283   :  { %v810_v16 = vadd.f32 %v809_v59, %v808_v61 }
 0x285   :  { %v812_v0 = vadd.f32 %v811_v3, %v810_v16 }
 0x286   :  { %v751_v33 = vpop.xlane.xlu0 %750  ;;  %v754_v24 = vpop.xlane.xlu1 %753 }
 0x287   :  { %v748_v48 = vpop.xlane.xlu2 %747  ;;  %v773_v63 = vadd.f32 %v751_v33, %v1824_v34  ;;  %v814_v6 = vadd.f32 %v813_v44, %v812_v0  ;;  %v774_v30 = vadd.f32 %v754_v24, %v1825_v39 }
 0x288   :  { %v772_v20 = vadd.f32 %v748_v48, %v1823_v22 }
 0x289   :  { %v817_v5 = vsel %vm793_vm3, %v773_v63, 0.0  ;;  %v819_v4 = vsel %vm793_vm3, %v774_v30, 0.0 }
 0x28a   :  { %v815_v18 = vsel %vm793_vm3, %v772_v20, 0.0 }
 0x28b   :  { %v816_v40 = vadd.f32 %v815_v18, %v814_v6 }
 0x28d   :  { %v818_v35 = vadd.f32 %v817_v5, %v816_v40 }
 0x28e   :  { %v760_v36 = vpop.xlane.xlu0 %759 }
 0x28f   :  { %v757_v32 = vpop.xlane.xlu2 %756  ;;  %v776_v41 = vadd.f32 %v760_v36, %v1827_v23  ;;  %v820_v54 = vadd.f32 %v819_v4, %v818_v35 }
 0x290   :  { %v775_v9 = vadd.f32 %v757_v32, %v1826_v11 }
 0x291   :  { %v823_v50 = vsel %vm793_vm3, %v776_v41, 0.0 }
 0x292   :  { %v821_v37 = vsel %vm793_vm3, %v775_v9, 0.0  ;;  %vm835_vm3 = vcmask 0  }
 0x293   :  { %v822_v46 = vadd.f32 %v821_v37, %v820_v54 }
 0x295   :  { %v824_v38 = vadd.f32 %v823_v50, %v822_v46 }
 0x297   :  { %825 = vadd.xlane.f32.xlu1 %v824_v38 }
 0x2b9   :  { %v566_v42 = vpop.f32.mrf.mxu1 }
 0x2ba   :  { %853 = vst.msk [vmem:[%s1790_s5] sm:$0xff] %vm62_vm0, %v566_v42 }
 0x2c7   :  { %v587_v29 = vpop.f32.mrf.mxu2 }
 0x2c8   :  { %860 = vst.msk [vmem:[%s1790_s5 + $0x38] sm:$0xff] %vm62_vm0, %v587_v29 }
 0x2ca   :  { %v569_v31 = vpop.f32.mrf.mxu1 }
 0x2cb   :  { %854 = vst.msk [vmem:[%s1790_s5 + $0x8] sm:$0xff] %vm62_vm0, %v569_v31 }
 0x2cf   :  { %v590_v43 = vpop.f32.mrf.mxu2 }
 0x2d0   :  { %861 = vst.msk [vmem:[%s1790_s5 + $0x40] sm:$0xff] %vm62_vm0, %v590_v43 }
 0x2d2   :  { %v572_v27 = vpop.f32.mrf.mxu1 }
 0x2d3   :  { %855 = vst.msk [vmem:[%s1790_s5 + $0x10] sm:$0xff] %vm62_vm0, %v572_v27 }
 0x2d7   :  { %v593_v7 = vpop.f32.mrf.mxu2 }
 0x2d8   :  { %862 = vst.msk [vmem:[%s1790_s5 + $0x48] sm:$0xff] %vm62_vm0, %v593_v7 }
 0x2da   :  { %v575_v52 = vpop.f32.mrf.mxu1 }
 0x2db   :  { %856 = vst.msk [vmem:[%s1790_s5 + $0x18] sm:$0xff] %vm62_vm0, %v575_v52 }
 0x2df   :  { %v596_v25 = vpop.f32.mrf.mxu2  ;;  %v608_v47 = vpop.f32.mrf.mxu3 }
 0x2e0   :  { %863 = vst.msk [vmem:[%s1790_s5 + $0x50] sm:$0xff] %vm62_vm0, %v596_v25 }
 0x2e1   :  { %867 = vst.msk [vmem:[%s1790_s5 + $0x70] sm:$0xff] %vm62_vm0, %v608_v47 }
 0x2e2   :  { %v578_v53 = vpop.f32.mrf.mxu1 }
 0x2e3   :  { %857 = vst.msk [vmem:[%s1790_s5 + $0x20] sm:$0xff] %vm62_vm0, %v578_v53 }
 0x2e7   :  { %v599_v17 = vpop.f32.mrf.mxu2  ;;  %v611_v15 = vpop.f32.mrf.mxu3 }
 0x2e8   :  { %864 = vst.msk [vmem:[%s1790_s5 + $0x58] sm:$0xff] %vm62_vm0, %v599_v17 }
 0x2e9   :  { %868 = vst.msk [vmem:[%s1790_s5 + $0x78] sm:$0xff] %vm62_vm0, %v611_v15 }
 0x2ea   :  { %v581_v13 = vpop.f32.mrf.mxu1 }
 0x2eb   :  { %858 = vst.msk [vmem:[%s1790_s5 + $0x28] sm:$0xff] %vm62_vm0, %v581_v13 }
 0x2ef   :  { %v602_v45 = vpop.f32.mrf.mxu2 }
 0x2f0   :  { %865 = vst.msk [vmem:[%s1790_s5 + $0x60] sm:$0xff] %vm62_vm0, %v602_v45 }
 0x2f2   :  { %v584_v58 = vpop.f32.mrf.mxu1 }
 0x2f3   :  { %859 = vst.msk [vmem:[%s1790_s5 + $0x30] sm:$0xff] %vm62_vm0, %v584_v58 }
 0x2f7   :  { %v605_v51 = vpop.f32.mrf.mxu2 }
 0x2f8   :  { %866 = vst.msk [vmem:[%s1790_s5 + $0x68] sm:$0xff] %vm62_vm0, %v605_v51 }
 0x30a   :  { %v826_v56 = vpop.xlane.xlu1 %825 }
 0x30b   :  { %v827_v26 = vrot.slane %v826_v56, 4 }
 0x30d   :  { %v828_v49 = vadd.f32 %v827_v26, %v826_v56 }
 0x30f   :  { %v829_v12 = vrot.slane %v828_v49, 2 }
 0x311   :  { %v830_v62 = vadd.f32 %v829_v12, %v828_v49 }
 0x313   :  { %v831_v2 = vrot.slane %v830_v62, 1 }
 0x315   :  { %v832_v57 = vadd.f32 %v831_v2, %v830_v62 }
 0x317   :  { %981 = vpush %v832_v57 }
 0x348   :  { %s982_s10 = spop %981 }
 0x349   :  { %v834_v14 = vstv %s982_s10 }
 0x34a   :  { %836 = vst.msk [vmem:[#allocation2] sm:$0x1] %vm835_vm3, %v834_v14 }
 0x34b   :  { %883 = dma.vmem_to_hbm [thread:$0]  %s879_s30, 16, %s881_s9, [#allocation3]  }
 0x34c   :  { %1010 = dma.done.wait [#allocation3], 16  }
 0x34d   :  { %1011 = vsyncadd [#allocation3], 4294967280 }
 0x34e   :  { %892 = vsyncpa [#allocation3], 1 }

</bundles_post_ra>
